<compile_context>
chip_gen: v5e
topology: v5e:2x2
jax: 0.10.0
libtpu: 0.0.40
codegen_flags: <defaults>
</compile_context>

<pallas_src>
import math

import jax
import jax.numpy as jnp
from jax import lax
from jax.experimental import pallas as pl
from jax.experimental.pallas import tpu as pltpu


_INV_SQRT2 = 1.0 / math.sqrt(2.0)


def _round_up(n, m):
    return ((n + m - 1) // m) * m


def _head_kernel(x_ref, g_ref, b_ref,
                 w1_ref, b1_ref, w2_ref, b2_ref, w3_ref, b3_ref,
                 o_ref):
    # --- LayerNorm over the feature axis (eps = 1e-5, PyTorch default), f32 ---
    x = x_ref[...].astype(jnp.float32)
    mean = jnp.mean(x, axis=-1, keepdims=True)
    cen = x - mean
    var = jnp.mean(cen * cen, axis=-1, keepdims=True)
    xn = cen * lax.rsqrt(var + 1e-5)
    xn = xn * g_ref[...] + b_ref[...]

    # --- MLP: Linear(D,4D) -> exact GELU -> Linear(4D,D) ---
    # bf16 operands into the MXU, f32 accumulation; element-wise math stays f32.
    h = jnp.dot(xn.astype(jnp.bfloat16), w1_ref[...],
                preferred_element_type=jnp.float32) + b1_ref[...]
    h = 0.5 * h * (1.0 + lax.erf(h * _INV_SQRT2))          # nn.GELU() exact
    y = jnp.dot(h.astype(jnp.bfloat16), w2_ref[...],
                preferred_element_type=jnp.float32) + b2_ref[...]
    # Dropout: identity at inference.  # TODO(synk): training-mode dropout not implemented

    # --- final classifier: Linear(D, C_pad) (C zero-padded to a lane-dense 128x) ---
    out = jnp.dot(y.astype(jnp.bfloat16), w3_ref[...],
                  preferred_element_type=jnp.float32) + b3_ref[...]
    o_ref[...] = out.astype(o_ref.dtype)


def act_classifier_head(x, params, *, tile_rows=256):
    """x: (B, T, D) float32. Returns (B, T, n_classes).

    tile_rows: row-tile height. 256 fits comfortably in v7x's 64 MiB VMEM with
    bf16-resident weights; 512 is a good choice on v6e/v5e (128 MiB VMEM) for
    realistic D. The wrapper pads the row count, so any B*T works.
    """
    B, T, D = x.shape
    N = B * T
    g, b, w1, b1, w2, b2, w3, b3 = params
    H = w1.shape[1]          # 4*D
    C = w3.shape[1]          # n_classes

    # ---- lane-dense classifier output: pad C (and w3/b3) to a multiple of 128 ----
    C_pad = _round_up(C, 128)
    if C_pad != C:
        w3 = jnp.pad(w3, ((0, 0), (0, C_pad - C)))
        b3 = jnp.pad(b3, ((0, 0), (0, C_pad - C)))

    # ---- row tiling: big MXU-friendly tiles, pad N instead of asserting ----
    tile_rows = max(8, min(tile_rows, _round_up(N, 8)))
    N_pad = _round_up(N, tile_rows)
    x2 = x.reshape(N, D)
    if N_pad != N:
        x2 = jnp.pad(x2, ((0, N_pad - N), (0, 0)))   # zero rows: LN-safe, sliced off

    # ---- bf16 weights: MXU-native on all generations, halves resident VMEM ----
    w1 = w1.astype(jnp.bfloat16)
    w2 = w2.astype(jnp.bfloat16)
    w3 = w3.astype(jnp.bfloat16)

    def rows_map(i):
        return (i, 0)

    def full_map(i):
        return (0, 0)

    flops = 2 * N_pad * (D * H + H * D + D * C_pad)
    bytes_accessed = (4 * N_pad * (D + C_pad)                      # x in, out
                      + 2 * (w1.size + w2.size + w3.size)          # bf16 weights
                      + 4 * (g.size + b.size + b1.size + b2.size + b3.size))
    cost = pl.CostEstimate(flops=int(flops),
                           transcendentals=int(N_pad * H),         # erf in GELU
                           bytes_accessed=int(bytes_accessed))

    out2 = pl.pallas_call(
        _head_kernel,
        out_shape=jax.ShapeDtypeStruct((N_pad, C_pad), x.dtype),
        grid_spec=pltpu.PrefetchScalarGridSpec(
            num_scalar_prefetch=0,
            grid=(N_pad // tile_rows,),
            in_specs=[
                pl.BlockSpec((tile_rows, D), rows_map),   # x rows
                pl.BlockSpec((1, D), full_map),           # ln gamma (f32)
                pl.BlockSpec((1, D), full_map),           # ln beta  (f32)
                pl.BlockSpec((D, H), full_map),           # w1 (bf16)
                pl.BlockSpec((1, H), full_map),           # b1 (f32)
                pl.BlockSpec((H, D), full_map),           # w2 (bf16)
                pl.BlockSpec((1, D), full_map),           # b2 (f32)
                pl.BlockSpec((D, C_pad), full_map),       # w3 (bf16, padded)
                pl.BlockSpec((1, C_pad), full_map),       # b3 (f32, padded)
            ],
            out_specs=pl.BlockSpec((tile_rows, C_pad), rows_map),
        ),
        compiler_params=pltpu.CompilerParams(
            dimension_semantics=("parallel",),
            vmem_limit_bytes=48 * 1024 * 1024),
        cost_estimate=cost,
    )(x2, g, b, w1, b1, w2, b2, w3, b3)

    return out2[:N, :C].reshape(B, T, C)


def init_params(key, n_embd, n_classes):
    """Deterministic synthetic init mirroring the PyTorch module's shapes."""
    D, H, C = n_embd, 4 * n_embd, n_classes
    k1, k2, k3 = jax.random.split(key, 3)

    def linear_init(k, fan_in, fan_out):
        bound = 1.0 / math.sqrt(fan_in)
        kw, kb = jax.random.split(k)
        w = jax.random.uniform(kw, (fan_in, fan_out), jnp.float32, -bound, bound)
        b = jax.random.uniform(kb, (1, fan_out), jnp.float32, -bound, bound)
        return w, b

    gamma = jnp.ones((1, D), jnp.float32)
    beta = jnp.zeros((1, D), jnp.float32)
    w1, b1 = linear_init(k1, D, H)
    w2, b2 = linear_init(k2, H, D)
    w3, b3 = linear_init(k3, D, C)
    return (gamma, beta, w1, b1, w2, b2, w3, b3)


def reference(x, params):
    """Plain-JAX f32 reference for a sanity check."""
    g, b, w1, b1, w2, b2, w3, b3 = params
    mean = jnp.mean(x, axis=-1, keepdims=True)
    var = jnp.mean((x - mean) ** 2, axis=-1, keepdims=True)
    xn = (x - mean) / jnp.sqrt(var + 1e-5) * g[0] + b[0]
    h = xn @ w1 + b1[0]
    h = 0.5 * h * (1.0 + lax.erf(h / math.sqrt(2.0)))
    y = h @ w2 + b2[0]
    return y @ w3 + b3[0]


if __name__ == "__main__":
    B, T, n_embd, n_classes = 2, 8, 32, 10
    p_drop = 0.1  # dropout is identity at inference

    key = jax.random.PRNGKey(0)
    kx, kp = jax.random.split(key)
    x = jax.random.normal(kx, (B, T, n_embd), jnp.float32)
    params = init_params(kp, n_embd, n_classes)

    out = act_classifier_head(x, params)
    out = jax.block_until_ready(out)

    ref = reference(x, params)
    assert out.shape == (B, T, n_classes)
    # bf16 matmul operands with f32 accumulation -> ~1e-2-level deviation vs f32 ref.
    assert jnp.allclose(out, ref, atol=2e-2, rtol=2e-2), "mismatch vs reference"

    print("KERNEL_OK")
</pallas_src>

<mosaic_0001>
module attributes {stable_mosaic.version = 11 : i64} {
  func.func @_head_kernel(%arg0: i32, %arg1: memref<16x32xf32, #tpu.memory_space<vmem>>, %arg2: memref<1x32xf32, #tpu.memory_space<vmem>>, %arg3: memref<1x32xf32, #tpu.memory_space<vmem>>, %arg4: memref<32x128xbf16, #tpu.memory_space<vmem>>, %arg5: memref<1x128xf32, #tpu.memory_space<vmem>>, %arg6: memref<128x32xbf16, #tpu.memory_space<vmem>>, %arg7: memref<1x32xf32, #tpu.memory_space<vmem>>, %arg8: memref<32x128xbf16, #tpu.memory_space<vmem>>, %arg9: memref<1x128xf32, #tpu.memory_space<vmem>>, %arg10: memref<16x128xf32, #tpu.memory_space<vmem>>) attributes {dimension_semantics = [#tpu.dimension_semantics<parallel>], iteration_bounds = array<i64: 1>, scalar_prefetch = 0 : i64, scratch_operands = 0 : i64, tpu.core_type = #tpu.core_type<tc>, window_params = [{transform_indices = @transform_0, window_bounds = array<i64: 16, 32>}, {pipeline_mode = #tpu.pipeline_mode<synchronous>, transform_indices = @transform_1, window_bounds = array<i64: 1, 32>}, {pipeline_mode = #tpu.pipeline_mode<synchronous>, transform_indices = @transform_2, window_bounds = array<i64: 1, 32>}, {pipeline_mode = #tpu.pipeline_mode<synchronous>, transform_indices = @transform_3, window_bounds = array<i64: 32, 128>}, {pipeline_mode = #tpu.pipeline_mode<synchronous>, transform_indices = @transform_4, window_bounds = array<i64: 1, 128>}, {pipeline_mode = #tpu.pipeline_mode<synchronous>, transform_indices = @transform_5, window_bounds = array<i64: 128, 32>}, {pipeline_mode = #tpu.pipeline_mode<synchronous>, transform_indices = @transform_6, window_bounds = array<i64: 1, 32>}, {pipeline_mode = #tpu.pipeline_mode<synchronous>, transform_indices = @transform_7, window_bounds = array<i64: 32, 128>}, {pipeline_mode = #tpu.pipeline_mode<synchronous>, transform_indices = @transform_8, window_bounds = array<i64: 1, 128>}, {transform_indices = @transform_9, window_bounds = array<i64: 16, 128>}]} {
    %c0 = arith.constant 0 : index
    %c0_0 = arith.constant 0 : index
    %0 = vector.load %arg1[%c0, %c0_0] : memref<16x32xf32, #tpu.memory_space<vmem>>, vector<16x32xf32>
    %cst = arith.constant dense<0.000000e+00> : vector<16xf32>
    %1 = vector.multi_reduction <add>, %0, %cst [1] : vector<16x32xf32> to vector<16xf32>
    %2 = vector.shape_cast %1 : vector<16xf32> to vector<16x1xf32>
    %cst_1 = arith.constant 3.200000e+01 : f32
    %3 = vector.broadcast %cst_1 : f32 to vector<16x1xf32>
    %4 = arith.divf %2, %3 : vector<16x1xf32>
    %5 = vector.broadcast %4 : vector<16x1xf32> to vector<16x32xf32>
    %6 = arith.subf %0, %5 : vector<16x32xf32>
    %7 = arith.mulf %6, %6 : vector<16x32xf32>
    %cst_2 = arith.constant dense<0.000000e+00> : vector<16xf32>
    %8 = vector.multi_reduction <add>, %7, %cst_2 [1] : vector<16x32xf32> to vector<16xf32>
    %9 = vector.shape_cast %8 : vector<16xf32> to vector<16x1xf32>
    %cst_3 = arith.constant 3.200000e+01 : f32
    %10 = vector.broadcast %cst_3 : f32 to vector<16x1xf32>
    %11 = arith.divf %9, %10 : vector<16x1xf32>
    %cst_4 = arith.constant 9.99999974E-6 : f32
    %12 = vector.broadcast %cst_4 : f32 to vector<16x1xf32>
    %13 = arith.addf %11, %12 : vector<16x1xf32>
    %14 = math.rsqrt %13 : vector<16x1xf32>
    %15 = vector.broadcast %14 : vector<16x1xf32> to vector<16x32xf32>
    %16 = arith.mulf %6, %15 : vector<16x32xf32>
    %c0_5 = arith.constant 0 : index
    %c0_6 = arith.constant 0 : index
    %17 = vector.load %arg2[%c0_5, %c0_6] : memref<1x32xf32, #tpu.memory_space<vmem>>, vector<1x32xf32>
    %18 = vector.broadcast %17 : vector<1x32xf32> to vector<16x32xf32>
    %19 = arith.mulf %16, %18 : vector<16x32xf32>
    %c0_7 = arith.constant 0 : index
    %c0_8 = arith.constant 0 : index
    %20 = vector.load %arg3[%c0_7, %c0_8] : memref<1x32xf32, #tpu.memory_space<vmem>>, vector<1x32xf32>
    %21 = vector.broadcast %20 : vector<1x32xf32> to vector<16x32xf32>
    %22 = arith.addf %19, %21 : vector<16x32xf32>
    %23 = arith.truncf %22 : vector<16x32xf32> to vector<16x32xbf16>
    %c0_9 = arith.constant 0 : index
    %c0_10 = arith.constant 0 : index
    %24 = vector.load %arg4[%c0_9, %c0_10] : memref<32x128xbf16, #tpu.memory_space<vmem>>, vector<32x128xbf16>
    %cst_11 = arith.constant dense<0.000000e+00> : vector<16x128xf32>
    %25 = tpu.matmul %23, %24, %cst_11 {dimension_numbers = #tpu.dot_dimension_numbers<[1], [0], [0], [1], [0, 0, 1, 1], [], []>} : vector<16x32xbf16>, vector<32x128xbf16>, vector<16x128xf32> -> vector<16x128xf32>
    %c0_12 = arith.constant 0 : index
    %c0_13 = arith.constant 0 : index
    %26 = vector.load %arg5[%c0_12, %c0_13] : memref<1x128xf32, #tpu.memory_space<vmem>>, vector<1x128xf32>
    %27 = vector.broadcast %26 : vector<1x128xf32> to vector<16x128xf32>
    %28 = arith.addf %25, %27 : vector<16x128xf32>
    %cst_14 = arith.constant 5.000000e-01 : f32
    %29 = vector.broadcast %cst_14 : f32 to vector<16x128xf32>
    %30 = arith.mulf %29, %28 : vector<16x128xf32>
    %cst_15 = arith.constant 0.707106769 : f32
    %31 = vector.broadcast %cst_15 : f32 to vector<16x128xf32>
    %32 = arith.mulf %28, %31 : vector<16x128xf32>
    %33 = math.erf %32 : vector<16x128xf32>
    %cst_16 = arith.constant 1.000000e+00 : f32
    %34 = vector.broadcast %cst_16 : f32 to vector<16x128xf32>
    %35 = arith.addf %34, %33 : vector<16x128xf32>
    %36 = arith.mulf %30, %35 : vector<16x128xf32>
    %37 = arith.truncf %36 : vector<16x128xf32> to vector<16x128xbf16>
    %c0_17 = arith.constant 0 : index
    %c0_18 = arith.constant 0 : index
    %38 = vector.load %arg6[%c0_17, %c0_18] : memref<128x32xbf16, #tpu.memory_space<vmem>>, vector<128x32xbf16>
    %cst_19 = arith.constant dense<0.000000e+00> : vector<16x32xf32>
    %39 = tpu.matmul %37, %38, %cst_19 {dimension_numbers = #tpu.dot_dimension_numbers<[1], [0], [0], [1], [0, 0, 1, 1], [], []>} : vector<16x128xbf16>, vector<128x32xbf16>, vector<16x32xf32> -> vector<16x32xf32>
    %c0_20 = arith.constant 0 : index
    %c0_21 = arith.constant 0 : index
    %40 = vector.load %arg7[%c0_20, %c0_21] : memref<1x32xf32, #tpu.memory_space<vmem>>, vector<1x32xf32>
    %41 = vector.broadcast %40 : vector<1x32xf32> to vector<16x32xf32>
    %42 = arith.addf %39, %41 : vector<16x32xf32>
    %43 = arith.truncf %42 : vector<16x32xf32> to vector<16x32xbf16>
    %c0_22 = arith.constant 0 : index
    %c0_23 = arith.constant 0 : index
    %44 = vector.load %arg8[%c0_22, %c0_23] : memref<32x128xbf16, #tpu.memory_space<vmem>>, vector<32x128xbf16>
    %cst_24 = arith.constant dense<0.000000e+00> : vector<16x128xf32>
    %45 = tpu.matmul %43, %44, %cst_24 {dimension_numbers = #tpu.dot_dimension_numbers<[1], [0], [0], [1], [0, 0, 1, 1], [], []>} : vector<16x32xbf16>, vector<32x128xbf16>, vector<16x128xf32> -> vector<16x128xf32>
    %c0_25 = arith.constant 0 : index
    %c0_26 = arith.constant 0 : index
    %46 = vector.load %arg9[%c0_25, %c0_26] : memref<1x128xf32, #tpu.memory_space<vmem>>, vector<1x128xf32>
    %47 = vector.broadcast %46 : vector<1x128xf32> to vector<16x128xf32>
    %48 = arith.addf %45, %47 : vector<16x128xf32>
    %c0_27 = arith.constant 0 : index
    %c0_28 = arith.constant 0 : index
    %49 = vector.load %arg10[%c0_27, %c0_28] : memref<16x128xf32, #tpu.memory_space<vmem>>, vector<16x128xf32>
    tpu.vector_store %arg10[%c0_27, %c0_28], %48 {strides = array<i32>} : memref<16x128xf32, #tpu.memory_space<vmem>>, vector<16x128xf32>,
    return
  }
  func.func @transform_0(%arg0: i32) -> (i32, i32) {
    %c0_i32 = arith.constant 0 : i32
    %c0_i32_0 = arith.constant 0 : i32
    return %arg0, %c0_i32 : i32, i32
  }
  func.func @transform_1(%arg0: i32) -> (i32, i32) {
    %c0_i32 = arith.constant 0 : i32
    %c0_i32_0 = arith.constant 0 : i32
    %c0_i32_1 = arith.constant 0 : i32
    return %c0_i32, %c0_i32_0 : i32, i32
  }
  func.func @transform_2(%arg0: i32) -> (i32, i32) {
    %c0_i32 = arith.constant 0 : i32
    %c0_i32_0 = arith.constant 0 : i32
    %c0_i32_1 = arith.constant 0 : i32
    return %c0_i32, %c0_i32_0 : i32, i32
  }
  func.func @transform_3(%arg0: i32) -> (i32, i32) {
    %c0_i32 = arith.constant 0 : i32
    %c0_i32_0 = arith.constant 0 : i32
    %c0_i32_1 = arith.constant 0 : i32
    return %c0_i32, %c0_i32_0 : i32, i32
  }
  func.func @transform_4(%arg0: i32) -> (i32, i32) {
    %c0_i32 = arith.constant 0 : i32
    %c0_i32_0 = arith.constant 0 : i32
    %c0_i32_1 = arith.constant 0 : i32
    return %c0_i32, %c0_i32_0 : i32, i32
  }
  func.func @transform_5(%arg0: i32) -> (i32, i32) {
    %c0_i32 = arith.constant 0 : i32
    %c0_i32_0 = arith.constant 0 : i32
    %c0_i32_1 = arith.constant 0 : i32
    return %c0_i32, %c0_i32_0 : i32, i32
  }
  func.func @transform_6(%arg0: i32) -> (i32, i32) {
    %c0_i32 = arith.constant 0 : i32
    %c0_i32_0 = arith.constant 0 : i32
    %c0_i32_1 = arith.constant 0 : i32
    return %c0_i32, %c0_i32_0 : i32, i32
  }
  func.func @transform_7(%arg0: i32) -> (i32, i32) {
    %c0_i32 = arith.constant 0 : i32
    %c0_i32_0 = arith.constant 0 : i32
    %c0_i32_1 = arith.constant 0 : i32
    return %c0_i32, %c0_i32_0 : i32, i32
  }
  func.func @transform_8(%arg0: i32) -> (i32, i32) {
    %c0_i32 = arith.constant 0 : i32
    %c0_i32_0 = arith.constant 0 : i32
    %c0_i32_1 = arith.constant 0 : i32
    return %c0_i32, %c0_i32_0 : i32, i32
  }
  func.func @transform_9(%arg0: i32) -> (i32, i32) {
    %c0_i32 = arith.constant 0 : i32
    %c0_i32_0 = arith.constant 0 : i32
    return %arg0, %c0_i32 : i32, i32
  }
}

</mosaic_0001>

<bundles_post_ra>
// kernel: tpu_custom_call.1
= control target key start
LH: loop header
LB: loop body
LE: loop exit
PB: predicated region body
PF: predicated region fallthrough
CT: control target
= control target key end

     0   :  { %vm36_vm0 = vcmask 261120   ;;  %s614_s0 = inlined_call_operand.vmem [shape: f32[16,32], index: 0, kind: input, shape index: {}]   ;;  %s615_s1 = inlined_call_operand.vmem [shape: f32[1,32], index: 1, kind: input, shape index: {}]   ;;  %s616_s2 = inlined_call_operand.vmem [shape: f32[1,32], index: 2, kind: input, shape index: {}]   ;;  %s617_s3 = inlined_call_operand.vmem [shape: bf16[32,128], index: 3, kind: input, shape index: {}]   ;;  %s618_s4 = inlined_call_operand.vmem [shape: f32[1,128], index: 4, kind: input, shape index: {}]   ;;  %s619_s5 = inlined_call_operand.vmem [shape: bf16[128,32], index: 5, kind: input, shape index: {}]   ;;  %s620_s6 = inlined_call_operand.vmem [shape: f32[1,32], index: 6, kind: input, shape index: {}]   ;;  %s621_s7 = inlined_call_operand.vmem [shape: bf16[32,128], index: 7, kind: input, shape index: {}]   ;;  %s622_s8 = inlined_call_operand.vmem [shape: f32[1,128], index: 8, kind: input, shape index: {}]   ;;  %s623_s9 = inlined_call_operand.hbm [shape: f32[16,128], index: 9, kind: output, shape index: {}]  }
   0x1   :  { %v34_v0 = vld [vmem:[%s614_s0] sm:$0xff] }
   0x2   :  { %v37_v1 = vsel %vm36_vm0, %v34_v0, 0.0 }
   0x3   :  { %38 = vadd.xlane.f32.xlu0 %v37_v1 }
   0x4   :  { %14 = vsyncpa [#allocation3], 0  ;;  %v35_v2 = vld [vmem:[%s614_s0 + $0x8] sm:$0xff]  ;;  %v476_v4 = vmov 32.0   ;;  %v419_v23 = vld [vmem:[%s617_s3] sm:$0xff]  ;;  %s479_s21 = smov 8  }
   0x5   :  { %v40_v3 = vsel %vm36_vm0, %v35_v2, 0.0  ;;  %440 = vrcp.f32 %v476_v4  ;;  %v420_v21 = vld [vmem:[%s617_s3 + $0x8] sm:$0xff]  ;;  %v435_v42 = vld [vmem:[%s615_s1] ss:$0 sm:$0xff]  ;;  %v428_v53 = vld [vmem:[%s619_s5 + $0x38] sm:$0xff]  ;;  %s355_s1 = sshll.u32 %s623_s9, 4  ;;  %s356_s1 = int_to_ptr.hbm [resolvable:$true] %s355_s1 }
   0x6   :  { %130 = vmatpush.bf16.msra.mxu0 %v420_v21  ;;  %v436_v47 = vld [vmem:[%s616_s2] ss:$0 sm:$0xff]  ;;  %295 = vmatpush.bf16.msra.mxu1 %v428_v53  ;;  %v427_v57 = vld [vmem:[%s619_s5 + $0x30] sm:$0xff]  ;;  %v426_v59 = vld [vmem:[%s619_s5 + $0x28] sm:$0xff] }
   0x7   :  { %v437_v52 = vld [vmem:[%s618_s4] ss:$0 sm:$0xff] }
   0xa   :  { %131 = vmatpush.bf16.msra.mxu0 %v419_v23  ;;  %296 = vmatpush.bf16.msra.mxu1 %v427_v57 }
   0xb   :  { %41 = vadd.xlane.f32.xlu0 %v40_v3  ;;  %v441_v5 = vpop.eup %440 }
   0xc   :  { %v44_v6 = vmul.f32 32.0, %v441_v5  ;;  %vm48_vm1 = vweird.f32 %v441_v5 }
   0xe   :  { %v45_v7 = vsub.f32 1.0, %v44_v6  ;;  %297 = vmatpush.bf16.msra.mxu1 %v426_v59  ;;  %v424_v6 = vld [vmem:[%s619_s5 + $0x18] sm:$0xff] }
  0x10   :  { %v46_v8 = vmul.f32 %v441_v5, %v45_v7 }
  0x12   :  { %v47_v9 = vadd.f32 %v441_v5, %v46_v8 }
  0x14   :  { %v49_v10 = vsel %vm48_vm1, %v441_v5, %v47_v9 }
  0x76   :  { %v39_v11 = vpop.xlane.xlu0 %38 }
  0x77   :  { %v50_v12 = vmul.f32 %v49_v10, %v39_v11 }
  0x79   :  { %v52_v13 = vsub.f32 %v34_v0, %v50_v12  ;;  %v425_v0 = vld [vmem:[%s619_s5 + $0x20] sm:$0xff]  ;;  %v423_v12 = vld [vmem:[%s619_s5 + $0x10] sm:$0xff] }
  0x7a   :  { %298 = vmatpush.bf16.msra.mxu1 %v425_v0 }
  0x7b   :  { %v54_v14 = vmul.f32 %v52_v13, %v52_v13 }
  0x7d   :  { %v56_v15 = vsel %vm36_vm0, %v54_v14, 0.0 }
  0x7e   :  { %57 = vadd.xlane.f32.xlu1 %v56_v15  ;;  %v42_v16 = vpop.xlane.xlu0 %41  ;;  %299 = vmatpush.bf16.msra.mxu1 %v424_v6 }
  0x7f   :  { %v51_v17 = vmul.f32 %v49_v10, %v42_v16 }
  0x81   :  { %v53_v18 = vsub.f32 %v35_v2, %v51_v17 }
  0x82   :  { %300 = vmatpush.bf16.msra.mxu1 %v423_v12 }
  0x83   :  { %v55_v19 = vmul.f32 %v53_v18, %v53_v18 }
  0x85   :  { %v59_v20 = vsel %vm36_vm0, %v55_v19, 0.0 }
  0x86   :  { %60 = vadd.xlane.f32.xlu1 %v59_v20  ;;  %v422_v20 = vld [vmem:[%s619_s5 + $0x8] sm:$0xff] }
  0x87   :  { %301 = vmatpush.bf16.msra.mxu1 %v422_v20 }
  0xf1   :  { %v58_v22 = vpop.xlane.xlu1 %57 }
  0xf2   :  { %v62_v24 = vmul.f32 %v58_v22, %v49_v10 }
  0xf4   :  { %v64_v25 = vadd.f32 1e-05, %v62_v24 }
  0xf6   :  { %442 = vrsqrt.f32 %v64_v25  ;;  %vm72_vm3 = vweird.f32 %v64_v25 }
  0xf9   :  { %v61_v26 = vpop.xlane.xlu1 %60 }
  0xfa   :  { %v63_v27 = vmul.f32 %v61_v26, %v49_v10 }
  0xfc   :  { %v443_v28 = vpop.eup %442  ;;  %v65_v29 = vadd.f32 1e-05, %v63_v27  ;;  %v421_v27 = vld [vmem:[%s619_s5] sm:$0xff] }
  0xfd   :  { %v67_v30 = vmul.f32 %v443_v28, %v64_v25  ;;  %vm73_vm2 = vweird.f32 %v443_v28  ;;  %302 = vmatpush.bf16.msra.mxu1 %v421_v27 }
  0xfe   :  { %444 = vrsqrt.f32 %v65_v29  ;;  %vm74_vm4 = vmor %vm72_vm3, %vm73_vm2  ;;  %vm82_vm6 = vweird.f32 %v65_v29 }
  0xff   :  { %v68_v31 = vmul.f32 %v443_v28, %v67_v30 }
 0x101   :  { %v69_v32 = vmul.f32 0.5, %v68_v31 }
 0x103   :  { %v70_v33 = vsub.f32 1.5, %v69_v32 }
 0x104   :  { %v445_v34 = vpop.eup %444 }
 0x105   :  { %v71_v35 = vmul.f32 %v443_v28, %v70_v33  ;;  %v77_v36 = vmul.f32 %v445_v34, %v65_v29  ;;  %vm83_vm5 = vweird.f32 %v445_v34 }
 0x106   :  { %vm84_vm7 = vmor %vm82_vm6, %vm83_vm5 }
 0x107   :  { %v78_v37 = vmul.f32 %v445_v34, %v77_v36  ;;  %v75_v38 = vsel %vm74_vm4, %v443_v28, %v71_v35 }
 0x108   :  { %v86_v41 = vmul.f32 %v75_v38, %v52_v13 }
 0x109   :  { %v79_v39 = vmul.f32 0.5, %v78_v37 }
 0x10a   :  { %v92_v46 = vmul.f32 %v435_v42, %v86_v41 }
 0x10b   :  { %v80_v40 = vsub.f32 1.5, %v79_v39 }
 0x10c   :  { %v98_v49 = vadd.f32 %v436_v47, %v92_v46 }
 0x10d   :  { %v81_v43 = vmul.f32 %v445_v34, %v80_v40 }
 0x10f   :  { %v85_v44 = vsel %vm84_vm7, %v445_v34, %v81_v43 }
 0x110   :  { %v87_v45 = vmul.f32 %v85_v44, %v53_v18 }
 0x112   :  { %v93_v48 = vmul.f32 %v435_v42, %v87_v45 }
 0x114   :  { %v99_v50 = vadd.f32 %v436_v47, %v93_v48 }
 0x116   :  { %v100_v51 = vpack.c.bf16 %v99_v50, %v98_v49 }
 0x118   :  { %375 = vmatmul.msk.bf16.vlgmr.msra.gmra.mxu0 %vm36_vm0, %v100_v51 }
 0x195   :  { %v133_v54 = vpop.f32.mrf.mxu0 }
 0x196   :  { %v559_v55 = vadd.f32 %v437_v52, %v133_v54 }
 0x198   :  { %v562_v56 = vmul.f32 0.70710677, %v559_v55 }
 0x19a   :  { %v142_v58 = vmul.f32 %v562_v56, %v562_v56 }
 0x19c   :  { %v143_v60 = vmin.f32 %v142_v58, 16.0 }
 0x19d   :  { %v135_v61 = vpop.f32.mrf.mxu0 }
 0x19e   :  { %v144_v62 = vmul.f32 2.1237322e-06, %v143_v60  ;;  %v572_v63 = vadd.f32 %v437_v52, %v135_v61  ;;  %v155_v1 = vmul.f32 3.8918573e-05, %v143_v60 }
 0x1a0   :  { %v145_v2 = vadd.f32 0.00028619796, %v144_v62  ;;  %v578_v3 = vmul.f32 0.70710677, %v572_v63  ;;  %v156_v4 = vadd.f32 0.001143296, %v155_v1 }
 0x1a2   :  { %v182_v5 = vmul.f32 %v578_v3, %v578_v3  ;;  %v146_v7 = vmul.f32 %v145_v2, %v143_v60  ;;  %v157_v8 = vmul.f32 %v156_v4, %v143_v60 }
 0x1a4   :  { %v183_v9 = vmin.f32 %v182_v5, 16.0  ;;  %v158_v10 = vadd.f32 0.014752088, %v157_v8  ;;  %v147_v14 = vadd.f32 0.0036580483, %v146_v7 }
 0x1a6   :  { %v184_v11 = vmul.f32 2.1237322e-06, %v183_v9  ;;  %v195_v13 = vmul.f32 3.8918573e-05, %v183_v9  ;;  %v159_v15 = vmul.f32 %v158_v10, %v143_v60  ;;  %v148_v22 = vmul.f32 %v147_v14, %v143_v60 }
 0x1a7   :  { %v139_v14 = vmul.f32 0.5, %v572_v63 }
 0x1a8   :  { %v185_v16 = vadd.f32 0.00028619796, %v184_v11  ;;  %v196_v17 = vadd.f32 0.001143296, %v195_v13  ;;  %v160_v18 = vadd.f32 0.112945676, %v159_v15 }
 0x1a9   :  { %v149_v29 = vadd.f32 0.05243302, %v148_v22  ;;  %v138_v13 = vmul.f32 0.5, %v559_v55  ;;  %v438_v55 = vld [vmem:[%s620_s6] ss:$0 sm:$0xff]  ;;  %s478_s6 = smov 128  }
 0x1aa   :  { %v186_v19 = vmul.f32 %v185_v16, %v183_v9  ;;  %v197_v21 = vmul.f32 %v196_v17, %v183_v9  ;;  %v161_v23 = vmul.f32 %v160_v18, %v143_v60 }
 0x1ab   :  { %v150_v35 = vmul.f32 %v149_v29, %v143_v60 }
 0x1ac   :  { %v187_v24 = vadd.f32 0.0036580483, %v186_v19  ;;  %v198_v25 = vadd.f32 0.014752088, %v197_v21  ;;  %v162_v26 = vadd.f32 0.4994258, %v161_v23 }
 0x1ad   :  { %v151_v39 = vadd.f32 0.18741608, %v150_v35  ;;  %v429_v19 = vld [vmem:[%s621_s7] sm:$0xff] }
 0x1ae   :  { %v199_v28 = vmul.f32 %v198_v25, %v183_v9  ;;  %v163_v30 = vmul.f32 %v162_v26, %v143_v60  ;;  %v188_v31 = vmul.f32 %v187_v24, %v183_v9  ;;  %v439_v24 = vld [vmem:[%s622_s8] ss:$0 sm:$0xff] }
 0x1af   :  { %v152_v44 = vmul.f32 %v151_v39, %v143_v60 }
 0x1b0   :  { %v200_v32 = vadd.f32 0.112945676, %v199_v28  ;;  %v164_v33 = vadd.f32 1.0, %v163_v30  ;;  %v189_v36 = vadd.f32 0.05243302, %v188_v31 }
 0x1b1   :  { %v153_v50 = vadd.f32 1.1283791, %v152_v44 }
 0x1b2   :  { %v201_v34 = vmul.f32 %v200_v32, %v183_v9  ;;  %446 = vrcp.f32 %v164_v33  ;;  %v190_v40 = vmul.f32 %v189_v36, %v183_v9  ;;  %v176_v47 = vand.u32 2147483648, %v164_v33 }
 0x1b3   :  { %v174_v49 = vand.u32 2147483647, %v164_v33  ;;  %vm170_vm9 = vweird.f32 %v164_v33  ;;  %v154_v59 = vmul.f32 %v153_v50, %v562_v56 }
 0x1b4   :  { %v202_v37 = vadd.f32 0.4994258, %v201_v34  ;;  %v191_v45 = vadd.f32 0.18741608, %v190_v40  ;;  %v177_v54 = vor.u32 1.1754944e-38, %v176_v47 }
 0x1b5   :  { %vm175_vm11 = vcmp.eq.f32.partialorder %v174_v49, 8.507059e+37 }
 0x1b6   :  { %v203_v38 = vmul.f32 %v202_v37, %v183_v9  ;;  %v192_v52 = vmul.f32 %v191_v45, %v183_v9 }
 0x1b8   :  { %v204_v41 = vadd.f32 1.0, %v203_v38  ;;  %v447_v42 = vpop.eup %446  ;;  %v193_v62 = vadd.f32 1.1283791, %v192_v52 }
 0x1b9   :  { %v166_v43 = vmul.f32 %v447_v42, %v164_v33  ;;  %vm171_vm8 = vweird.f32 %v447_v42 }
 0x1ba   :  { %448 = vrcp.f32 %v204_v41  ;;  %vm172_vm10 = vmor %vm170_vm9, %vm171_vm8  ;;  %v216_v0 = vand.u32 2147483648, %v204_v41  ;;  %v214_v4 = vand.u32 2147483647, %v204_v41  ;;  %vm210_vm13 = vweird.f32 %v204_v41 }
 0x1bb   :  { %v167_v46 = vsub.f32 1.0, %v166_v43  ;;  %v194_v7 = vmul.f32 %v193_v62, %v578_v3  ;;  %v430_v3 = vld [vmem:[%s621_s7 + $0x8] sm:$0xff]  ;;  %s477_s7 = smov [#allocation2]  }
 0x1bc   :  { %v217_v6 = vor.u32 1.1754944e-38, %v216_v0  ;;  %vm215_vm15 = vcmp.eq.f32.partialorder %v214_v4, 8.507059e+37  ;;  %339 = vmatpush.bf16.msra.mxu2 %v430_v3  ;;  %s353_s18 = sshll.u32 %s477_s7, 4  ;;  %s354_s18 = int_to_ptr.vmem [resolvable:$true] %s353_s18 }
 0x1bd   :  { %v168_v48 = vmul.f32 %v447_v42, %v167_v46 }
 0x1bf   :  { %v169_v53 = vadd.f32 %v447_v42, %v168_v48 }
 0x1c0   :  { %v449_v51 = vpop.eup %448  ;;  %340 = vmatpush.bf16.msra.mxu2 %v429_v19 }
 0x1c1   :  { %v206_v57 = vmul.f32 %v449_v51, %v204_v41  ;;  %v173_v58 = vsel %vm172_vm10, %v447_v42, %v169_v53  ;;  %vm211_vm12 = vweird.f32 %v449_v51 }
 0x1c2   :  { %v178_v61 = vsel %vm175_vm11, %v177_v54, %v173_v58  ;;  %vm212_vm14 = vmor %vm210_vm13, %vm211_vm12 }
 0x1c3   :  { %v207_v60 = vsub.f32 1.0, %v206_v57  ;;  %v179_v1 = vmul.f32 %v178_v61, %v154_v59 }
 0x1c5   :  { %v208_v2 = vmul.f32 %v449_v51, %v207_v60  ;;  %v376_v8 = vclamps-f32 %v179_v1, 1.0 }
 0x1c7   :  { %v209_v5 = vadd.f32 %v449_v51, %v208_v2  ;;  %v222_v12 = vadd.f32 1.0, %v376_v8 }
 0x1c9   :  { %v213_v9 = vsel %vm212_vm14, %v449_v51, %v209_v5  ;;  %v224_v16 = vmul.f32 %v222_v12, %v138_v13 }
 0x1ca   :  { %v218_v10 = vsel %vm215_vm15, %v217_v6, %v213_v9 }
 0x1cb   :  { %v219_v11 = vmul.f32 %v218_v10, %v194_v7 }
 0x1cd   :  { %v377_v56 = vclamps-f32 %v219_v11, 1.0 }
 0x1cf   :  { %v223_v15 = vadd.f32 1.0, %v377_v56 }
 0x1d1   :  { %v225_v17 = vmul.f32 %v223_v15, %v139_v14 }
 0x1d3   :  { %v226_v18 = vpack.c.bf16 %v225_v17, %v224_v16 }
 0x1d5   :  { %303 = vmatmul.bf16.vlgmr.msra.gmra.mxu1 %v226_v18 }
 0x252   :  { %v304_v20 = vpop.f32.mrf.mxu1 }
 0x253   :  { %v305_v21 = vadd.f32 %v438_v55, %v304_v20 }
 0x25a   :  { %v306_v63 = vpop.f32.mrf.mxu1 }
 0x25b   :  { %v307_v22 = vadd.f32 %v438_v55, %v306_v63 }
 0x25d   :  { %v309_v23 = vpack.c.bf16 %v307_v22, %v305_v21 }
 0x25f   :  { %418 = vmatmul.msk.bf16.vlgmr.msra.gmra.mxu2 %vm36_vm0, %v309_v23 }
 0x2e2   :  { %v342_v25 = vpop.f32.mrf.mxu2 }
 0x2e3   :  { %v343_v26 = vadd.f32 %v439_v24, %v342_v25 }
 0x2e5   :  { %347 = vst [vmem:[#allocation2] sm:$0xff] %v343_v26 }
 0x2ea   :  { %v344_v27 = vpop.f32.mrf.mxu2 }
 0x2eb   :  { %v345_v28 = vadd.f32 %v439_v24, %v344_v27 }
 0x2ed   :  { %348 = vst [vmem:[#allocation2 + $0x8] sm:$0xff] %v345_v28 }
 0x2ee   :  { %361 = dma.vmem_to_hbm [thread:$0]  %s354_s18, 256, %s356_s1, [#allocation3], %s478_s6, %s478_s6, %s479_s21  }
 0x2ef   :  { %474 = dma.done.wait [#allocation3], 256  }
 0x2f0   :  { %475 = vsyncadd [#allocation3], 4294967040 }
 0x2f1   :  { %366 = vsyncpa [#allocation3], 1 }

</bundles_post_ra>
